<compile_context>
chip_gen: v7x
topology: tpu7x:2x2x1
jax: 0.10.0
libtpu: 0.0.40
codegen_flags: <defaults>
</compile_context>

<pallas_src>
import functools
import math

import jax
import jax.numpy as jnp
from jax import lax
from jax.experimental import pallas as pl
from jax.experimental.pallas import tpu as pltpu


def _sublane_multiple(dtype):
    """Second-to-last-dim packing multiple: f32 -> 8, bf16 -> 16, int8/fp8 -> 32."""
    return max(8, 32 // jnp.dtype(dtype).itemsize)


def _round_up(v, m):
    return ((v + m - 1) // m) * m


def _vmem_capacity_bytes():
    try:
        return int(pltpu.get_tpu_info().vmem_capacity_bytes)
    except Exception:
        return 64 * 1024 * 1024          # conservative default (v7x per-core VMEM)


def _conv_d517_rows_kernel(mask_ref, x_ref, o_ref, *, shift):
    """Whole flattened rows per block.  x_ref/o_ref: (TN, L); mask_ref: (1, L)."""
    x = x_ref[...]
    # rolled[:, p] = x[:, (p + s) % L] with s = 2*W - 2: one XLU lane rotation on
    # the flattened spatial axis (sign convention checked vs reference in main).
    rolled = pltpu.roll(x, shift=shift, axis=1)
    o_ref[...] = jnp.where(mask_ref[...] > 0, x - rolled, x)


def _conv_d517_chunk_kernel(mask_ref, x_ref, halo_ref, o_ref, *, s):
    """Column-chunked path for huge images.

    x_ref/o_ref: (TN, TC) chunk of the flattened image; halo_ref: (TN, TH) holds
    the next TH flattened elements of the same rows (TH >= s); mask_ref: (1, TC).
    """
    x = x_ref[...]
    if s == 0:
        shifted = x
    else:
        h = halo_ref[...]
        # shifted[:, q] = row[p + s]  for global flat position p of lane q.
        shifted = jnp.concatenate([x[:, s:], h[:, :s]], axis=1)
    o_ref[...] = jnp.where(mask_ref[...] > 0, x - shifted, x)


def conv_d517(x, *, row_block=None, col_chunk=None, fold=True):
    """out[n,0,y,x] = x[n,0,y,x] - x[n,0,y+2,x-2]  (terms outside the image are 0).

    Equivalent to F.conv2d(x, weight, padding=2) with the fixed Conv_d517 weight.
    `row_block` / `col_chunk` / `fold` are test/tuning overrides only.
    """
    N, C, H, W = x.shape
    assert C == 1, "Conv_d517 weight has in_channels = 1"
    dtype = x.dtype
    itemsize = jnp.dtype(dtype).itemsize
    sub = _sublane_multiple(dtype)
    rows, hw = N * C, H * W
    s = 2 * W - 2                                  # flat offset of tap in[y+2, x-2]

    vmem_cap = _vmem_capacity_bytes()
    # ~8-12 MiB blocks amortize the ~0.35us/grid-step overhead even at v7x's
    # 3.2 TB/s, while pipelined in+out blocks stay well inside VMEM
    # (64 MiB on v7x, 128 MiB on v5e/v6e).
    target_block = min(12 << 20, vmem_cap // 7)
    path_a_limit = vmem_cap // 6

    # ---- lane folding: pack G whole images into one lane row so the last dim is
    # a multiple of 128 -> full-width unmasked vector stores. --------------------
    G = 1
    if fold and hw % 128 != 0:
        g = 128 // math.gcd(hw, 128)
        if rows % g == 0:
            G = g
    R, L = rows // G, G * hw
    row_bytes = L * itemsize

    # ---- choose path: whole-row blocks (a) vs column-chunked + halo (b). -------
    use_chunked = col_chunk is not None
    if not use_chunked and min(sub, R) * row_bytes > path_a_limit:
        use_chunked = True
    tc = th = None
    if use_chunked:
        # Chunked path works on the unfolded (rows, hw) layout.
        R, L, row_bytes = rows, hw, hw * itemsize
        th = _round_up(max(s, 1), 128)             # lane-aligned halo width >= shift
        tn = min(sub, R)
        if col_chunk is not None:
            tc = int(col_chunk)
            assert tc % th == 0 and hw % tc == 0, "bad forced col_chunk"
        else:
            kmax = max(1, (target_block // max(1, tn * itemsize)) // th)
            for k in range(int(kmax), 0, -1):
                if hw % (k * th) == 0:
                    tc = k * th
                    break
        if tc is None or tc >= hw:
            # TODO(synk): no lane-aligned chunk size divides H*W; fall back to
            # whole-row blocks (may exceed VMEM for extreme image sizes).
            use_chunked = False
            R, L = rows // G, G * hw
            row_bytes = L * itemsize

    # Precomputed validity mask, hoisted out of the per-step body: flat position
    # p within its image is valid iff  (p % W) >= 2  and  p < (H-2)*W.
    col = jnp.arange(L, dtype=jnp.int32)
    j = col % hw
    valid = ((j % W) >= 2) & (j < (H - 2) * W)
    mask = valid.astype(dtype).reshape(1, L)

    x2 = x.reshape(R, L)                           # free row-major reshape, lane-dense

    if not use_chunked:
        # ------------------------- path (a): row blocks -------------------------
        total_bytes = R * row_bytes
        if row_block is not None:
            tn = int(row_block)
        else:
            tn = max(1, target_block // row_bytes)
            if total_bytes > (2 << 20):
                # Keep >= 4 grid steps so the "parallel" axis can be sharded
                # across v7x's two TensorCores (no-op on 1-TC v5e/v6e).
                tn = min(tn, pl.cdiv(R, 4))
            if tn >= R:
                tn = R                             # full second-last dim: always legal
            elif tn % sub != 0:
                tn = max(sub, (tn // sub) * sub)   # dtype-dependent sublane multiple
                tn = min(tn, R)
        steps = pl.cdiv(R, tn)
        block_bytes = tn * L * itemsize
        vmem_limit = int(min(vmem_cap * 7 // 8,
                             max(32 << 20, 6 * block_bytes + (1 << 20))))
        x_spec = pl.BlockSpec((tn, L), lambda i: (i, 0))
        # Triple-buffer the input only when blocks are big, there are enough
        # steps, and VMEM has headroom (hides DMA issue jitter on v7x).
        if (block_bytes >= (4 << 20) and steps >= 3
                and 5 * block_bytes + (2 << 20) <= vmem_limit):
            x_spec = pl.BlockSpec((tn, L), lambda i: (i, 0),
                                  pipeline_mode=pl.Buffered(3))
        kernel = functools.partial(_conv_d517_rows_kernel,
                                   shift=(L - (s % L)) % L)
        out2 = pl.pallas_call(
            kernel,
            out_shape=jax.ShapeDtypeStruct((R, L), dtype),
            grid=(steps,),
            in_specs=[pl.BlockSpec((1, L), lambda i: (0, 0)),    # resident mask
                      x_spec],
            out_specs=pl.BlockSpec((tn, L), lambda i: (i, 0)),
            compiler_params=pltpu.CompilerParams(
                dimension_semantics=("parallel",),
                vmem_limit_bytes=vmem_limit),
            cost_estimate=pl.CostEstimate(
                flops=2 * R * L, transcendentals=0,
                bytes_accessed=2 * R * L * itemsize),
        )(mask, x2)
        return out2.reshape(N, C, H, W)

    # --------------- path (b): 2-D grid, column chunks + small halo ---------------
    ratio = tc // th
    n_chunks = hw // tc
    last_halo = hw // th - 1
    steps_r = pl.cdiv(R, tn)
    block_bytes = tn * tc * itemsize
    vmem_limit = int(min(vmem_cap * 7 // 8,
                         max(32 << 20, 6 * block_bytes + (1 << 20))))
    x_spec = pl.BlockSpec((tn, tc), lambda i, jj: (i, jj))
    # Halo = the next `th` flattened elements; for the last chunk it is clamped
    # to an in-bounds block (its contents are never selected there: mask == 0).
    halo_spec = pl.BlockSpec(
        (tn, th), lambda i, jj: (i, jnp.minimum((jj + 1) * ratio, last_halo)))
    mask_spec = pl.BlockSpec((1, tc), lambda i, jj: (0, jj))
    kernel = functools.partial(_conv_d517_chunk_kernel, s=s)
    out2 = pl.pallas_call(
        kernel,
        out_shape=jax.ShapeDtypeStruct((R, hw), dtype),
        grid=(steps_r, n_chunks),
        in_specs=[mask_spec, x_spec, halo_spec],
        out_specs=x_spec,
        compiler_params=pltpu.CompilerParams(
            dimension_semantics=("parallel", "parallel"),
            vmem_limit_bytes=vmem_limit),
        cost_estimate=pl.CostEstimate(
            flops=2 * R * hw, transcendentals=0,
            bytes_accessed=(2 * R * hw + R * n_chunks * th) * itemsize),
    )(mask, x2, x2)
    return out2.reshape(N, C, H, W)


def conv_d517_reference(x):
    # Pure-JAX reference using the same fixed weight from Conv_d517.__init__.
    w = jnp.zeros((5, 5), dtype=x.dtype).at[2, 2].set(1.0).at[4, 0].set(-1.0)
    w = w.reshape(1, 1, 5, 5)
    return lax.conv_general_dilated(
        x, w, window_strides=(1, 1), padding=((2, 2), (2, 2)),
        dimension_numbers=("NCHW", "OIHW", "NCHW"))


if __name__ == "__main__":
    # 1) Small shape consistent with the module (in_channels = 1).
    x = jax.random.normal(jax.random.PRNGKey(0), (2, 1, 16, 16), dtype=jnp.float32)
    out = conv_d517(x)
    jax.block_until_ready(out)
    assert out.shape == (2, 1, 16, 16)
    assert jnp.allclose(out, conv_d517_reference(x), atol=1e-6), "rows path mismatch"

    # 2) Lane-folding path (H*W = 576 not a multiple of 128 -> 2 images per row).
    x2 = jax.random.normal(jax.random.PRNGKey(1), (10, 1, 24, 24), dtype=jnp.float32)
    out2 = conv_d517(x2)
    jax.block_until_ready(out2)
    assert jnp.allclose(out2, conv_d517_reference(x2), atol=1e-6), "folded path mismatch"

    # 3) Multi-step row-block path (2 grid steps, no folding).
    x3 = jax.random.normal(jax.random.PRNGKey(2), (16, 1, 24, 24), dtype=jnp.float32)
    out3 = conv_d517(x3, fold=False, row_block=8)
    jax.block_until_ready(out3)
    assert jnp.allclose(out3, conv_d517_reference(x3), atol=1e-6), "row-block path mismatch"

    # 4) Column-chunked + halo path (exercised at a small size by forcing tc).
    x4 = jax.random.normal(jax.random.PRNGKey(3), (1, 1, 64, 256), dtype=jnp.float32)
    out4 = conv_d517(x4, col_chunk=2048)
    jax.block_until_ready(out4)
    assert jnp.allclose(out4, conv_d517_reference(x4), atol=1e-6), "chunked path mismatch"

    print("KERNEL_OK")
</pallas_src>

<mosaic_0001>
module attributes {stable_mosaic.version = 11 : i64} {
  func.func @_conv_d517_rows_kernel(%arg0: i32, %arg1: memref<1x256xf32, #tpu.memory_space<vmem>>, %arg2: memref<2x256xf32, #tpu.memory_space<vmem>>, %arg3: memref<2x256xf32, #tpu.memory_space<vmem>>) attributes {dimension_semantics = [#tpu.dimension_semantics<parallel>], iteration_bounds = array<i64: 1>, scalar_prefetch = 0 : i64, scratch_operands = 0 : i64, tpu.core_type = #tpu.core_type<tc>, window_params = [{pipeline_mode = #tpu.pipeline_mode<synchronous>, transform_indices = @transform_0, window_bounds = array<i64: 1, 256>}, {transform_indices = @transform_1, window_bounds = array<i64: 2, 256>}, {transform_indices = @transform_2, window_bounds = array<i64: 2, 256>}]} {
    %c0 = arith.constant 0 : index
    %c0_0 = arith.constant 0 : index
    %0 = vector.load %arg2[%c0, %c0_0] : memref<2x256xf32, #tpu.memory_space<vmem>>, vector<2x256xf32>
    %c226_i32 = arith.constant 226 : i32
    %1 = tpu.dynamic_rotate %0 by %c226_i32 dim 1 : vector<2x256xf32>, i32 -> vector<2x256xf32>
    %c0_1 = arith.constant 0 : index
    %c0_2 = arith.constant 0 : index
    %2 = vector.load %arg1[%c0_1, %c0_2] : memref<1x256xf32, #tpu.memory_space<vmem>>, vector<1x256xf32>
    %cst = arith.constant 0.000000e+00 : f32
    %3 = vector.broadcast %cst : f32 to vector<1x256xf32>
    %4 = arith.cmpf ogt, %2, %3 : vector<1x256xf32>
    %5 = arith.subf %0, %1 : vector<2x256xf32>
    %6 = vector.shape_cast %4 : vector<1x256xi1> to vector<1x256xi1>
    %7 = vector.broadcast %6 : vector<1x256xi1> to vector<2x256xi1>
    %8 = arith.select %7, %5, %0 : vector<2x256xi1>, vector<2x256xf32>
    %c0_3 = arith.constant 0 : index
    %c0_4 = arith.constant 0 : index
    %9 = vector.load %arg3[%c0_3, %c0_4] : memref<2x256xf32, #tpu.memory_space<vmem>>, vector<2x256xf32>
    tpu.vector_store %arg3[%c0_3, %c0_4], %8 {strides = array<i32>} : memref<2x256xf32, #tpu.memory_space<vmem>>, vector<2x256xf32>,
    return
  }
  func.func @transform_0(%arg0: i32) -> (i32, i32) {
    %c0_i32 = arith.constant 0 : i32
    %c0_i32_0 = arith.constant 0 : i32
    %c0_i32_1 = arith.constant 0 : i32
    return %c0_i32, %c0_i32_0 : i32, i32
  }
  func.func @transform_1(%arg0: i32) -> (i32, i32) {
    %c0_i32 = arith.constant 0 : i32
    %c0_i32_0 = arith.constant 0 : i32
    return %arg0, %c0_i32 : i32, i32
  }
  func.func @transform_2(%arg0: i32) -> (i32, i32) {
    %c0_i32 = arith.constant 0 : i32
    %c0_i32_0 = arith.constant 0 : i32
    return %arg0, %c0_i32 : i32, i32
  }
}

</mosaic_0001>

<bundles_post_ra>
// kernel: tpu_custom_call.1
= control target key start
LH: loop header
LB: loop body
LE: loop exit
PB: predicated region body
PF: predicated region fallthrough
CT: control target
= control target key end

     0   :  { %7 = vsyncpa [#allocation3], 0  ;;  %s259_s0 = inlined_call_operand.hbm [shape: f32[1,256], index: 0, kind: input, shape index: {}]   ;;  %s260_s1 = inlined_call_operand.hbm [shape: f32[2,256], index: 1, kind: input, shape index: {}]   ;;  %s261_s2 = inlined_call_operand.hbm [shape: f32[2,256], index: 2, kind: output, shape index: {}]  }
   0x1   :  { %8 = vsyncpa [#allocation6], 0 }
   0x2   :  { %9 = vsyncpa [#allocation4], 0  ;;  %s202_s9 = smov [#allocation2]   ;;  %s203_s11 = smov [#allocation5]  }
   0x3   :  { %s16_s10 = sshll.u32 %s202_s9, 4  ;;  %s26_s12 = sshll.u32 %s203_s11, 4  ;;  %s17_s10 = int_to_ptr.vmem [resolvable:$true] %s16_s10  ;;  %s27_s12 = int_to_ptr.vmem [resolvable:$true] %s26_s12 }
   0x4   :  { %s130_s15 = scalar_lea.hbm %s259_s0, 32 }
   0x5   :  { %p131_p0 = scmp.ne.s32.totalorder %s259_s0, %s130_s15  ;;  %p134_p1 = scmp.lt.u32.totalorder %s130_s15, %s259_s0 }
   0x7   :  { %p136_p2 = pnand %p134_p1, %p131_p0 }
   0x9   :  { %139 = shalt.err (!%p136_p2)
}
   0xa   :  { %s140_s20 = scalar_lea.vmem %s17_s10, 32  ;;  %p145_p4 = scmp.lt.s32.totalorder %s17_s10, %s17_s10 }
   0xb   :  { %p141_p3 = scmp.ne.s32.totalorder %s17_s10, %s140_s20  ;;  %p146_p5 = scmp.lt.s32.totalorder %s140_s20, %s140_s20 }
   0xd   :  { %p147_p6 = por %p146_p5, %p145_p4 }
   0xf   :  { %p148_p7 = pnand %p147_p6, %p141_p3 }
  0x11   :  { %151 = shalt.err (!%p148_p7)
}
  0x12   :  { %19 = dma.hbm_to_vmem [thread:$0]  %s259_s0, 32, %s17_s10, [#allocation3]  }
  0x13   :  { %s152_s25 = scalar_lea.hbm %s260_s1, 64 }
  0x14   :  { %p153_p8 = scmp.ne.s32.totalorder %s260_s1, %s152_s25  ;;  %p156_p9 = scmp.lt.u32.totalorder %s152_s25, %s260_s1 }
  0x16   :  { %p158_p10 = pnand %p156_p9, %p153_p8 }
  0x18   :  { %161 = shalt.err (!%p158_p10)
}
  0x19   :  { %s162_s30 = scalar_lea.vmem %s27_s12, 64  ;;  %p167_p12 = scmp.lt.s32.totalorder %s27_s12, %s27_s12 }
  0x1a   :  { %p163_p11 = scmp.ne.s32.totalorder %s27_s12, %s162_s30  ;;  %p168_p13 = scmp.lt.s32.totalorder %s162_s30, %s162_s30 }
  0x1c   :  { %p169_p0 = por %p168_p13, %p167_p12 }
  0x1e   :  { %p170_p1 = pnand %p169_p0, %p163_p11 }
  0x20   :  { %173 = shalt.err (!%p170_p1)
}
  0x21   :  { %29 = dma.hbm_to_vmem [thread:$0]  %s260_s1, 64, %s27_s12, [#allocation6]  }
  0x22   :  { %196 = dma.done.wait [#allocation3], 32  }
  0x23   :  { %197 = vsyncadd [#allocation3], 4294967264 }
  0x24   :  { %198 = dma.done.wait [#allocation6], 64  }
  0x25   :  { %199 = vsyncadd [#allocation6], 4294967232  ;;  %v41_v0 = vlaneseq  ;;  %v204_v1 = vmov 1983009808   ;;  %v36_v6 = vld [vmem:[#allocation5] sm:$0xf] }
  0x26   :  { %v39_v2 = vunpack.c.l.s4 %v204_v1  ;;  %s205_s4 = smov 98   ;;  %v57_v10 = vld [vmem:[#allocation2] sm:$0x3]  ;;  %v206_v14 = vmov 0   ;;  %s207_s1 = smov [#allocation7]  }
  0x27   :  { %v42_v3 = vshrl.u32 %v41_v0, 7  ;;  %v53_v9 = vand.u32 127, %v41_v0  ;;  %vm58_vm0 = vcmp.gt.f32.partialorder %v57_v10, 0.0  ;;  %s113_s5 = sshll.u32 %s207_s1, 4  ;;  %s114_s5 = int_to_ptr.vmem [resolvable:$true] %s113_s5 }
  0x28   :  { %v40_v4 = vunpack.c.0.s8 %v39_v2  ;;  %v71_v15 = vsel %vm58_vm0, 1, %v206_v14  ;;  %s174_s6 = scalar_lea.vmem %s114_s5, 64  ;;  %p179_p3 = scmp.lt.s32.totalorder %s114_s5, %s114_s5 }
  0x29   :  { %vm54_vm1 = vcmp.lt.s32.totalorder %v53_v9, 98  ;;  %v74_v12 = vsub.s32 0, %v42_v3  ;;  %v78_v18 = vsub.s32 1, %v42_v3  ;;  %p175_p2 = scmp.ne.s32.totalorder %s114_s5, %s174_s6  ;;  %p180_p4 = scmp.lt.s32.totalorder %s174_s6, %s174_s6 }
  0x2a   :  { %v43_v5 = vsub.s32 %v40_v4, %v42_v3 }
  0x2b   :  { %v75_v20 = vrot.slane %v71_v15, %v74_v12  ;;  %v79_v22 = vrot.slane %v71_v15, %v78_v18  ;;  %p181_p5 = por %p180_p4, %p179_p3 }
  0x2c   :  { %v44_v7 = vrot.slane %v36_v6, %v43_v5 }
  0x2d   :  { %vm80_vm2 = vcmp.eq.s32.totalorder %v75_v20, 1  ;;  %vm81_vm3 = vcmp.eq.s32.totalorder %v79_v22, 1  ;;  %p182_p6 = pnand %p181_p5, %p175_p2 }
  0x2e   :  { %48 = vrot.lane.b32.xlu0 %v44_v7, %s205_s4  ;;  %v45_v8 = vcombine.high %v44_v7, %v44_v7 }
  0x32   :  { %50 = vrot.lane.b32.xlu0 %v45_v8, %s205_s4 }
  0xa0   :  { %v49_v11 = vpop.permute.xlu0 %48 }
  0xa4   :  { %v51_v13 = vpop.permute.xlu0 %50 }
  0xa5   :  { %v55_v16 = vsel %vm54_vm1, %v49_v11, %v51_v13  ;;  %v56_v17 = vsel %vm54_vm1, %v51_v13, %v49_v11 }
  0xa6   :  { %v61_v19 = vcombine.low %v55_v16, %v56_v17 }
  0xa8   :  { %v68_v21 = vrot.slane %v61_v19, %v43_v5 }
  0xaa   :  { %v70_v23 = vsub.f32 %v36_v6, %v68_v21 }
  0xac   :  { %v89_v24 = vrot.slane %v70_v23, %v43_v5 }
  0xae   :  { %v90_v25 = vcombine.high %v89_v24, %v89_v24  ;;  %v93_v26 = vsel %vm80_vm2, %v89_v24, %v44_v7 }
  0xb0   :  { %v94_v27 = vsel %vm81_vm3, %v90_v25, %v45_v8 }
  0xb1   :  { %v97_v28 = vcombine.low %v93_v26, %v94_v27 }
  0xb3   :  { %123 = vst.sshfl [vmem:[#allocation7] sm:$0x33 pattern:$0x76325410] %v97_v28 }
  0xb4   :  { %185 = shalt.err (!%p182_p6)
}
  0xb5   :  { %s186_s9 = scalar_lea.hbm %s261_s2, 64 }
  0xb6   :  { %p187_p7 = scmp.ne.s32.totalorder %s261_s2, %s186_s9  ;;  %p190_p8 = scmp.lt.u32.totalorder %s186_s9, %s261_s2 }
  0xb8   :  { %p192_p9 = pnand %p190_p8, %p187_p7 }
  0xba   :  { %195 = shalt.err (!%p192_p9)
}
  0xbb   :  { %116 = dma.vmem_to_hbm [thread:$0]  %s114_s5, 64, %s261_s2, [#allocation4]  }
  0xbc   :  { %200 = dma.done.wait [#allocation4], 64  }
  0xbd   :  { %201 = vsyncadd [#allocation4], 4294967232 }
  0xbe   :  { %120 = vsyncpa [#allocation3], 1 }
  0xbf   :  { %121 = vsyncpa [#allocation6], 1 }
  0xc0   :  { %122 = vsyncpa [#allocation4], 1 }

</bundles_post_ra>
